<compile_context>
chip_gen: v7x
topology: tpu7x:2x2x1
jax: 0.10.0
libtpu: 0.0.40
codegen_flags: <defaults>
</compile_context>

<pallas_src>
import functools

import jax
import jax.numpy as jnp
from jax.experimental import pallas as pl
from jax.experimental.pallas import tpu as pltpu


def _round_up(x: int, m: int) -> int:
    return ((x + m - 1) // m) * m


# ---------------------------------------------------------------------------
# Kernel
# ---------------------------------------------------------------------------
def resnetflow_kernel(h_ref, dt_ref, w1h_ref, w1dt_ref, b1_ref, w2_ref, b2_ref,
                      out_ref):
    """Fused ResNetFlow forward on one batch tile.

    h_ref    : (TB, D)   hidden state tile (native storage dtype)
    dt_ref   : (TB, 1)   time increment
    w1h_ref  : (D, H)    layer-1 weight (hidden part), pre-transposed
    w1dt_ref : (1, H)    layer-1 weight row that multiplies dt
    b1_ref   : (1, H)
    w2_ref   : (H, D)    layer-2 weight, pre-transposed
    b2_ref   : (1, D)
    out_ref  : (TB, D)
    """
    h = h_ref[...]                                  # keep storage dtype for MXU
    dt_f = dt_ref[...].astype(jnp.float32)          # (TB, 1)

    # Layer 1:  [h | dt] @ W1^T  ==  h @ W1h^T  +  dt (x) w1_dt_row   (rank-1)
    z1 = jnp.dot(h, w1h_ref[...], preferred_element_type=jnp.float32)
    z1 = z1 + dt_f * w1dt_ref[...].astype(jnp.float32) \
            + b1_ref[...].astype(jnp.float32)
    a1 = jnp.tanh(z1)                               # f32 EUP

    # Layer 2
    z2 = jnp.dot(a1.astype(w2_ref.dtype), w2_ref[...],
                 preferred_element_type=jnp.float32)
    a2 = jnp.tanh(z2 + b2_ref[...].astype(jnp.float32))

    # Residual with time gating: hidden + tanh(dt) * net(...)
    out_ref[...] = (h.astype(jnp.float32) + jnp.tanh(dt_f) * a2).astype(out_ref.dtype)


# ---------------------------------------------------------------------------
# One-time parameter preprocessing (spectral norm + transpose + dtype)
# ---------------------------------------------------------------------------
def spectral_normalize(w, u0, n_power_iterations=1, eps=1e-12):
    """PyTorch-style spectral_norm forward-time weight value.

    w  : (out_features, in_features);  u0 : (out_features,)
    """
    def _normalize(x):
        return x / jnp.maximum(jnp.linalg.norm(x), eps)   # matches F.normalize clamp

    u = _normalize(u0)
    v = None
    for _ in range(n_power_iterations):
        v = _normalize(w.T @ u)
        u = _normalize(w @ v)
    sigma = u @ (w @ v)
    return w / sigma
    # TODO(synk): PyTorch updates the `u` buffer in-place across training-mode
    # forwards; here it is a fixed input (eval-mode semantics).


def prepare_params(params, dtype=jnp.float32):
    """Spectral-normalize, transpose to [in, out], cast to storage dtype.

    Call ONCE per weight update; the result is reused across flow steps.
    Returns (w1h, w1dt, b1, w2, b2) with shapes (D,H), (1,H), (1,H), (H,D), (1,D).
    """
    w1_sn = spectral_normalize(params["w1"], params["u1"])   # (H, D+1)
    w2_sn = spectral_normalize(params["w2"], params["u2"])   # (D, H)
    w1t = w1_sn.T                                             # (D+1, H)
    d_plus_1, H = w1t.shape
    D = d_plus_1 - 1

    w1h = w1t[:D, :].astype(dtype)                            # (D, H)
    w1dt = w1t[D:D + 1, :].astype(dtype)                      # (1, H)
    b1 = params["b1"].reshape(1, H).astype(dtype)
    w2 = w2_sn.T.astype(dtype)                                # (H, D)
    b2 = params["b2"].reshape(1, D).astype(dtype)
    return w1h, w1dt, b1, w2, b2


# ---------------------------------------------------------------------------
# Per-call forward
# ---------------------------------------------------------------------------
@functools.partial(jax.jit, static_argnames=("batch_tile",))
def resnetflow_forward(hidden, dt, prep, *, batch_tile=1024):
    w1h, w1dt, b1, w2, b2 = prep
    B, D = hidden.shape
    H = w1h.shape[1]

    # Batch tile: large enough to amortize the ~0.35us/grid-step overhead,
    # capped so the grid has >= 2 steps when possible (v7x megacore sharding),
    # and a multiple of 8 (sublane) unless it is the full batch.
    tb = min(batch_tile, _round_up(pl.cdiv(B, 2), 8))
    tb = max(tb, 8)
    if tb >= B:
        tb = B                       # single full-dim block (any B is legal)
    grid = (pl.cdiv(B, tb),)

    w_bytes = sum(int(w.size) * w.dtype.itemsize for w in (w1h, w1dt, b1, w2, b2))
    io_bytes = hidden.dtype.itemsize * 2 * B * D + dt.dtype.itemsize * B
    cost = pl.CostEstimate(
        flops=2 * B * ((D + 1) * H + H * D),
        transcendentals=B * (H + D + 1),
        bytes_accessed=io_bytes + w_bytes,
    )

    return pl.pallas_call(
        resnetflow_kernel,
        out_shape=jax.ShapeDtypeStruct((B, D), hidden.dtype),
        grid=grid,
        in_specs=[
            pl.BlockSpec((tb, D), lambda i: (i, 0)),   # hidden (batch-tiled)
            pl.BlockSpec((tb, 1), lambda i: (i, 0)),   # dt     (batch-tiled)
            pl.BlockSpec((D, H), lambda i: (0, 0)),    # w1 hidden part (VMEM-resident)
            pl.BlockSpec((1, H), lambda i: (0, 0)),    # w1 dt row
            pl.BlockSpec((1, H), lambda i: (0, 0)),    # b1
            pl.BlockSpec((H, D), lambda i: (0, 0)),    # w2
            pl.BlockSpec((1, D), lambda i: (0, 0)),    # b2
        ],
        out_specs=pl.BlockSpec((tb, D), lambda i: (i, 0)),
        compiler_params=pltpu.CompilerParams(
            dimension_semantics=("parallel",),         # megacore on v7x
        ),
        cost_estimate=cost,
    )(hidden, dt, w1h, w1dt, b1, w2, b2)


# ---------------------------------------------------------------------------
# Pure-JAX reference (matches the PyTorch module)
# ---------------------------------------------------------------------------
def reference_forward(hidden, dt, params):
    w1_sn = spectral_normalize(params["w1"], params["u1"])
    w2_sn = spectral_normalize(params["w2"], params["u2"])
    x = jnp.concatenate([hidden, dt], axis=1)
    a1 = jnp.tanh(jnp.dot(x, w1_sn.T, precision=jax.lax.Precision.HIGHEST)
                  + params["b1"])
    a2 = jnp.tanh(jnp.dot(a1, w2_sn.T, precision=jax.lax.Precision.HIGHEST)
                  + params["b2"])
    return hidden + jnp.tanh(dt) * a2


if __name__ == "__main__":
    # Shapes consistent with the module: Linear(input_size+1, hidden),
    # Linear(hidden, input_size).
    batch = 8
    input_size = 16
    hidden_size = 32

    key = jax.random.PRNGKey(0)
    (k_h, k_dt, k_w1, k_b1, k_w2, k_b2, k_u1, k_u2,
     k_h2, k_dt2) = jax.random.split(key, 10)

    hidden = jax.random.normal(k_h, (batch, input_size), dtype=jnp.float32)
    dt = jax.random.uniform(k_dt, (batch, 1), dtype=jnp.float32)

    params = {
        # nn.Linear weights: (out_features, in_features)
        "w1": jax.random.normal(k_w1, (hidden_size, input_size + 1),
                                dtype=jnp.float32) * 0.2,
        "b1": jax.random.normal(k_b1, (hidden_size,), dtype=jnp.float32) * 0.1,
        "w2": jax.random.normal(k_w2, (input_size, hidden_size),
                                dtype=jnp.float32) * 0.2,
        "b2": jax.random.normal(k_b2, (input_size,), dtype=jnp.float32) * 0.1,
        # deterministic power-iteration vectors (PyTorch uses random normal u)
        "u1": jax.random.normal(k_u1, (hidden_size,), dtype=jnp.float32),
        "u2": jax.random.normal(k_u2, (input_size,), dtype=jnp.float32),
    }

    # --- f32 storage, small batch (single tile) ---------------------------
    prep_f32 = jax.block_until_ready(prepare_params(params, dtype=jnp.float32))
    out = jax.block_until_ready(resnetflow_forward(hidden, dt, prep_f32))
    ref = reference_forward(hidden, dt, params)
    assert out.shape == (batch, input_size)
    assert jnp.allclose(out, ref, atol=1e-4, rtol=1e-4), "f32 mismatch vs reference"

    # --- f32 storage, larger batch (2-step grid, megacore-friendly) -------
    batch2 = 192
    hidden2 = jax.random.normal(k_h2, (batch2, input_size), dtype=jnp.float32)
    dt2 = jax.random.uniform(k_dt2, (batch2, 1), dtype=jnp.float32)
    out2 = jax.block_until_ready(resnetflow_forward(hidden2, dt2, prep_f32))
    ref2 = reference_forward(hidden2, dt2, params)
    assert out2.shape == (batch2, input_size)
    assert jnp.allclose(out2, ref2, atol=1e-4, rtol=1e-4), "f32 batch mismatch"

    # --- bf16 HBM storage (halves the dominant DMA streams), f32 compute --
    prep_bf16 = jax.block_until_ready(prepare_params(params, dtype=jnp.bfloat16))
    out_bf = jax.block_until_ready(
        resnetflow_forward(hidden.astype(jnp.bfloat16),
                           dt.astype(jnp.bfloat16), prep_bf16))
    assert out_bf.dtype == jnp.bfloat16 and out_bf.shape == (batch, input_size)
    assert jnp.allclose(out_bf.astype(jnp.float32), ref, atol=5e-2, rtol=5e-2), \
        "bf16 mismatch vs reference"

    print("KERNEL_OK")
</pallas_src>

<mosaic_0001>
module attributes {stable_mosaic.version = 11 : i64} {
  func.func @resnetflow_kernel(%arg0: i32, %arg1: memref<8x16xf32, #tpu.memory_space<vmem>>, %arg2: memref<8x1xf32, #tpu.memory_space<vmem>>, %arg3: memref<16x32xf32, #tpu.memory_space<vmem>>, %arg4: memref<1x32xf32, #tpu.memory_space<vmem>>, %arg5: memref<1x32xf32, #tpu.memory_space<vmem>>, %arg6: memref<32x16xf32, #tpu.memory_space<vmem>>, %arg7: memref<1x16xf32, #tpu.memory_space<vmem>>, %arg8: memref<8x16xf32, #tpu.memory_space<vmem>>) attributes {dimension_semantics = [#tpu.dimension_semantics<parallel>], iteration_bounds = array<i64: 1>, scalar_prefetch = 0 : i64, scratch_operands = 0 : i64, tpu.core_type = #tpu.core_type<tc>, window_params = [{transform_indices = @transform_0, window_bounds = array<i64: 8, 16>}, {transform_indices = @transform_1, window_bounds = array<i64: 8, 1>}, {pipeline_mode = #tpu.pipeline_mode<synchronous>, transform_indices = @transform_2, window_bounds = array<i64: 16, 32>}, {pipeline_mode = #tpu.pipeline_mode<synchronous>, transform_indices = @transform_3, window_bounds = array<i64: 1, 32>}, {pipeline_mode = #tpu.pipeline_mode<synchronous>, transform_indices = @transform_4, window_bounds = array<i64: 1, 32>}, {pipeline_mode = #tpu.pipeline_mode<synchronous>, transform_indices = @transform_5, window_bounds = array<i64: 32, 16>}, {pipeline_mode = #tpu.pipeline_mode<synchronous>, transform_indices = @transform_6, window_bounds = array<i64: 1, 16>}, {transform_indices = @transform_7, window_bounds = array<i64: 8, 16>}]} {
    %c0 = arith.constant 0 : index
    %c0_0 = arith.constant 0 : index
    %0 = vector.load %arg1[%c0, %c0_0] : memref<8x16xf32, #tpu.memory_space<vmem>>, vector<8x16xf32>
    %c0_1 = arith.constant 0 : index
    %c0_2 = arith.constant 0 : index
    %1 = vector.load %arg2[%c0_1, %c0_2] : memref<8x1xf32, #tpu.memory_space<vmem>>, vector<8x1xf32>
    %c0_3 = arith.constant 0 : index
    %c0_4 = arith.constant 0 : index
    %2 = vector.load %arg3[%c0_3, %c0_4] : memref<16x32xf32, #tpu.memory_space<vmem>>, vector<16x32xf32>
    %cst = arith.constant dense<0.000000e+00> : vector<8x32xf32>
    %3 = tpu.matmul %0, %2, %cst {dimension_numbers = #tpu.dot_dimension_numbers<[1], [0], [0], [1], [0, 0, 1, 1], [], []>} : vector<8x16xf32>, vector<16x32xf32>, vector<8x32xf32> -> vector<8x32xf32>
    %c0_5 = arith.constant 0 : index
    %c0_6 = arith.constant 0 : index
    %4 = vector.load %arg4[%c0_5, %c0_6] : memref<1x32xf32, #tpu.memory_space<vmem>>, vector<1x32xf32>
    %5 = vector.broadcast %1 : vector<8x1xf32> to vector<8x32xf32>
    %6 = vector.broadcast %4 : vector<1x32xf32> to vector<8x32xf32>
    %7 = arith.mulf %5, %6 : vector<8x32xf32>
    %8 = arith.addf %3, %7 : vector<8x32xf32>
    %c0_7 = arith.constant 0 : index
    %c0_8 = arith.constant 0 : index
    %9 = vector.load %arg5[%c0_7, %c0_8] : memref<1x32xf32, #tpu.memory_space<vmem>>, vector<1x32xf32>
    %10 = vector.broadcast %9 : vector<1x32xf32> to vector<8x32xf32>
    %11 = arith.addf %8, %10 : vector<8x32xf32>
    %12 = math.tanh %11 : vector<8x32xf32>
    %c0_9 = arith.constant 0 : index
    %c0_10 = arith.constant 0 : index
    %13 = vector.load %arg6[%c0_9, %c0_10] : memref<32x16xf32, #tpu.memory_space<vmem>>, vector<32x16xf32>
    %cst_11 = arith.constant dense<0.000000e+00> : vector<8x16xf32>
    %14 = tpu.matmul %12, %13, %cst_11 {dimension_numbers = #tpu.dot_dimension_numbers<[1], [0], [0], [1], [0, 0, 1, 1], [], []>} : vector<8x32xf32>, vector<32x16xf32>, vector<8x16xf32> -> vector<8x16xf32>
    %c0_12 = arith.constant 0 : index
    %c0_13 = arith.constant 0 : index
    %15 = vector.load %arg7[%c0_12, %c0_13] : memref<1x16xf32, #tpu.memory_space<vmem>>, vector<1x16xf32>
    %16 = vector.broadcast %15 : vector<1x16xf32> to vector<8x16xf32>
    %17 = arith.addf %14, %16 : vector<8x16xf32>
    %18 = math.tanh %17 : vector<8x16xf32>
    %19 = math.tanh %1 : vector<8x1xf32>
    %20 = vector.broadcast %19 : vector<8x1xf32> to vector<8x16xf32>
    %21 = arith.mulf %20, %18 : vector<8x16xf32>
    %22 = arith.addf %0, %21 : vector<8x16xf32>
    %c0_14 = arith.constant 0 : index
    %c0_15 = arith.constant 0 : index
    %23 = vector.load %arg8[%c0_14, %c0_15] : memref<8x16xf32, #tpu.memory_space<vmem>>, vector<8x16xf32>
    tpu.vector_store %arg8[%c0_14, %c0_15], %22 {strides = array<i32>} : memref<8x16xf32, #tpu.memory_space<vmem>>, vector<8x16xf32>,
    return
  }
  func.func @transform_0(%arg0: i32) -> (i32, i32) {
    %c0_i32 = arith.constant 0 : i32
    %c0_i32_0 = arith.constant 0 : i32
    return %arg0, %c0_i32 : i32, i32
  }
  func.func @transform_1(%arg0: i32) -> (i32, i32) {
    %c0_i32 = arith.constant 0 : i32
    %c0_i32_0 = arith.constant 0 : i32
    return %arg0, %c0_i32 : i32, i32
  }
  func.func @transform_2(%arg0: i32) -> (i32, i32) {
    %c0_i32 = arith.constant 0 : i32
    %c0_i32_0 = arith.constant 0 : i32
    %c0_i32_1 = arith.constant 0 : i32
    return %c0_i32, %c0_i32_0 : i32, i32
  }
  func.func @transform_3(%arg0: i32) -> (i32, i32) {
    %c0_i32 = arith.constant 0 : i32
    %c0_i32_0 = arith.constant 0 : i32
    %c0_i32_1 = arith.constant 0 : i32
    return %c0_i32, %c0_i32_0 : i32, i32
  }
  func.func @transform_4(%arg0: i32) -> (i32, i32) {
    %c0_i32 = arith.constant 0 : i32
    %c0_i32_0 = arith.constant 0 : i32
    %c0_i32_1 = arith.constant 0 : i32
    return %c0_i32, %c0_i32_0 : i32, i32
  }
  func.func @transform_5(%arg0: i32) -> (i32, i32) {
    %c0_i32 = arith.constant 0 : i32
    %c0_i32_0 = arith.constant 0 : i32
    %c0_i32_1 = arith.constant 0 : i32
    return %c0_i32, %c0_i32_0 : i32, i32
  }
  func.func @transform_6(%arg0: i32) -> (i32, i32) {
    %c0_i32 = arith.constant 0 : i32
    %c0_i32_0 = arith.constant 0 : i32
    %c0_i32_1 = arith.constant 0 : i32
    return %c0_i32, %c0_i32_0 : i32, i32
  }
  func.func @transform_7(%arg0: i32) -> (i32, i32) {
    %c0_i32 = arith.constant 0 : i32
    %c0_i32_0 = arith.constant 0 : i32
    return %arg0, %c0_i32 : i32, i32
  }
}

</mosaic_0001>

<bundles_post_ra>
// kernel: resnetflow_forward.1
= control target key start
LH: loop header
LB: loop body
LE: loop exit
PB: predicated region body
PF: predicated region fallthrough
CT: control target
= control target key end

     0   :  { %v312_v2 = vmov 0.0|0.0   ;;  %vm313_vm0 = vmmov 0   ;;  %v314_v4 = vmov 0.0   ;;  %v315_v6 = vmov 0   ;;  %s404_s0 = inlined_call_operand.vmem [shape: f32[8,16], index: 0, kind: input, shape index: {}]   ;;  %s405_s1 = inlined_call_operand.vmem [shape: f32[8,1], index: 1, kind: input, shape index: {}]   ;;  %s406_s2 = inlined_call_operand.vmem [shape: f32[16,32], index: 2, kind: input, shape index: {}]   ;;  %s407_s3 = inlined_call_operand.vmem [shape: f32[1,32], index: 3, kind: input, shape index: {}]   ;;  %s408_s4 = inlined_call_operand.vmem [shape: f32[1,32], index: 4, kind: input, shape index: {}]   ;;  %s409_s5 = inlined_call_operand.vmem [shape: f32[32,16], index: 5, kind: input, shape index: {}]   ;;  %s410_s6 = inlined_call_operand.vmem [shape: f32[1,16], index: 6, kind: input, shape index: {}]   ;;  %s411_s7 = inlined_call_operand.hbm [shape: f32[8,16], index: 7, kind: output, shape index: {}]  }
   0x1   :  { %v29_v0 = vld [vmem:[%s406_s2] sm:$0xff]  ;;  %v30_v1 = vld [vmem:[%s406_s2 + $0x8] sm:$0xff]  ;;  %267 = vmatprep.subr.bf16.mxu0 %v312_v2  ;;  %253 = vmatprep.mubr.msk.f32.mxu0 %vm313_vm0, %v314_v4 }
   0x2   :  { %v268_v3 = vpack.c.bf16 %v30_v1, %v29_v0  ;;  %v28_v5 = vld [vmem:[%s405_s1] sm:$0xff]  ;;  %281 = vset.pattern.permute.xlu0 %v315_v6  ;;  %270 = vmatprep.subr.bf16.mxu1 %v312_v2 }
   0x3   :  { %282 = vtanh.f32 %v28_v5 }
   0x4   :  { %12 = vsyncpa [#allocation3], 0  ;;  %269 = vmatpush3.bf16.msra.mxu0 %v268_v3  ;;  %v27_v7 = vld [vmem:[%s404_s0] sm:$0xff]  ;;  %vm44_vm1 = vcmask 130048   ;;  %34 = vperm.xlu0 %281, %v28_v5   ;;  %v128_v10 = vld [vmem:[%s409_s5 + $0x8] sm:$0xff]  ;;  %vm138_vm2 = vcmask 261120  }
   0x5   :  { %264 = vmatprep.mubr.msk.f32.mxu1 %vm313_vm0, %v314_v4  ;;  %v127_v9 = vld [vmem:[%s409_s5] sm:$0xff]  ;;  %v129_v11 = vld [vmem:[%s409_s5 + $0x10] sm:$0xff]  ;;  %v130_v13 = vld [vmem:[%s409_s5 + $0x18] sm:$0xff] }
   0x6   :  { %v271_v12 = vpack.c.bf16 %v128_v10, %v127_v9  ;;  %v274_v14 = vpack.c.bf16 %v130_v13, %v129_v11  ;;  %v236_v15 = vld [vmem:[%s407_s3] ss:$0 sm:$0xff]  ;;  %s316_s3 = smov [#allocation2]  }
   0x7   :  { %254 = vmatmul.mubr.msk.f32.vlgmr.msra.gmra.mrb[0].mxu0 %vm44_vm1, %v27_v7  ;;  %v238_v19 = vld [vmem:[%s408_s4] ss:$0 sm:$0xff]  ;;  %s228_s19 = sshll.u32 %s316_s3, 4  ;;  %s229_s19 = int_to_ptr.vmem [resolvable:$true] %s228_s19 }
   0x8   :  { %272 = vmatpush3.bf16.msra.mxu1 %v271_v12  ;;  %v239_v24 = vld [vmem:[%s410_s6] ss:$0 sm:$0xff]  ;;  %s288_s4 = scalar_lea.vmem %s229_s19, 128  ;;  %p293_p1 = scmp.lt.s32.totalorder %s229_s19, %s229_s19 }
   0x9   :  { %273 = vmatprep.subr.bf16.mxu1 %v312_v2  ;;  %p289_p0 = scmp.ne.s32.totalorder %s229_s19, %s288_s4  ;;  %p294_p2 = scmp.lt.s32.totalorder %s288_s4, %s288_s4 }
   0xb   :  { %p295_p3 = por %p294_p2, %p293_p1 }
   0xc   :  { %275 = vmatpush3.bf16.msra.mxu1 %v274_v14 }
   0xd   :  { %v283_v8 = vpop.eup %282  ;;  %p296_p4 = pnand %p295_p3, %p289_p0 }
   0xe   :  { %216 = vperm.xlu0 %281, %v283_v8  }
  0x83   :  { %v35_v16 = vpop.permute.xlu0 %34 }
  0x84   :  { %v43_v17 = vmul.f32 %v236_v15, %v35_v16 }
  0x8d   :  { %v217_v29 = vpop.permute.xlu0 %216 }
  0xda   :  { %v114_v18 = vpop.f32.mrb[0].mxu0 }
  0xdb   :  { %v115_v20 = vadd.f32 %v114_v18, %v43_v17  ;;  %v255_v21 = vpop.f32.mrb[1].mxu0 }
  0xdd   :  { %v125_v22 = vadd.f32 %v238_v19, %v115_v20 }
  0xdf   :  { %284 = vtanh.f32 %v125_v22 }
  0xe9   :  { %v285_v23 = vpop.eup %284 }
  0xea   :  { %265 = vmatmul.mubr.msk.f32.vlgmr.msra.gmra.mrb[0].mxu1 %vm138_vm2, %v285_v23 }
 0x1bd   :  { %v208_v25 = vpop.f32.mrb[0].mxu1 }
 0x1be   :  { %v209_v26 = vadd.f32 %v239_v24, %v208_v25  ;;  %v266_v27 = vpop.f32.mrb[1].mxu1 }
 0x1c0   :  { %286 = vtanh.f32 %v209_v26 }
 0x1ca   :  { %v287_v28 = vpop.eup %286 }
 0x1cb   :  { %v219_v30 = vmul.f32 %v287_v28, %v217_v29 }
 0x1cd   :  { %v220_v31 = vadd.f32 %v219_v30, %v27_v7 }
 0x1cf   :  { %221 = vst.msk [vmem:[#allocation2] sm:$0xff] %vm44_vm1, %v220_v31 }
 0x1d0   :  { %299 = shalt.err (!%p296_p4)
}
 0x1d1   :  { %s300_s21 = scalar_lea.hbm %s411_s7, 128 }
 0x1d2   :  { %p301_p5 = scmp.ne.s32.totalorder %s411_s7, %s300_s21  ;;  %p304_p6 = scmp.lt.u32.totalorder %s300_s21, %s411_s7 }
 0x1d4   :  { %p306_p7 = pnand %p304_p6, %p301_p5 }
 0x1d6   :  { %309 = shalt.err (!%p306_p7)
}
 0x1d7   :  { %231 = dma.vmem_to_hbm [thread:$0]  %s229_s19, 128, %s411_s7, [#allocation3]  }
 0x1d8   :  { %310 = dma.done.wait [#allocation3], 128  }
 0x1d9   :  { %311 = vsyncadd [#allocation3], 4294967168 }
 0x1da   :  { %235 = vsyncpa [#allocation3], 1 }

</bundles_post_ra>
